<compile_context>
chip_gen: v6e
topology: v6e:2x2x1
jax: 0.10.0
libtpu: 0.0.40
codegen_flags: <defaults>
</compile_context>

<pallas_src>
import functools

import jax
import jax.numpy as jnp
from jax.experimental import pallas as pl
from jax.experimental.pallas import tpu as pltpu

# Real layer widths (PyTorch module) and lane-padded widths.
IN_F, H1_F, H2_F, OUT_F = 784, 200, 50, 10
H1_P, H2_P, OUT_P = 256, 128, 128          # output-lane pads (multiples of 128)


def mlp_kernel(x_ref, w1_ref, b1_ref, w2_ref, b2_ref, w3_ref, b3_ref, out_ref):
    # x: [TB, 784] f32 -> cast to bf16 right before the MXU (VPU work, hidden
    # under the input DMA; all constants below are Python literals so nothing
    # is captured as a traced const).
    x = x_ref[...].astype(jnp.bfloat16)

    # fc1 + relu : [TB, 784] @ [784, 256] -> f32 acc, f32 bias add
    h1 = jnp.dot(x, w1_ref[...], preferred_element_type=jnp.float32) + b1_ref[...]
    h1 = jnp.maximum(h1, 0.0).astype(jnp.bfloat16)

    # fc2 + relu : [TB, 256] @ [256, 128]
    h2 = jnp.dot(h1, w2_ref[...], preferred_element_type=jnp.float32) + b2_ref[...]
    h2 = jnp.maximum(h2, 0.0).astype(jnp.bfloat16)

    # fc3 : [TB, 128] @ [128, 128]
    logits = jnp.dot(h2, w3_ref[...], preferred_element_type=jnp.float32) + b3_ref[...]

    # Mask padded logit lanes (>= 10) so they don't affect max / sum.
    lane = jax.lax.broadcasted_iota(jnp.int32, logits.shape, dimension=1)
    logits = jnp.where(lane < OUT_F, logits, -1e30)

    # Numerically-stable log_softmax over the lane dim (all in f32).
    m = jnp.max(logits, axis=-1, keepdims=True)
    shifted = logits - m
    lse = jnp.log(jnp.sum(jnp.exp(shifted), axis=-1, keepdims=True))
    out_ref[...] = shifted - lse


def _round_up(n, m):
    return ((n + m - 1) // m) * m


def _cdiv(a, b):
    return -(-a // b)


def _choose_tile(B, tile_b):
    """Pick a batch tile that (a) stays <= tile_b (capped at 2048 for v7x's
    64 MiB VMEM), (b) spreads B evenly over tiles to avoid dead-row padding,
    and (c) yields >= 2 grid steps for B >= 16 so both v7x TCs get work."""
    tile_b = max(8, min(tile_b, 2048))
    n_tiles = max(1, _cdiv(B, tile_b))
    if B >= 16 and n_tiles < 2:
        n_tiles = 2
    tb = _round_up(_cdiv(B, n_tiles), 8)
    Bp = _round_up(B, tb)
    return tb, Bp


@functools.partial(jax.jit, static_argnames=("tile_b",))
def t_model_forward(x_nchw, params, tile_b=1024):
    """x_nchw: [B, 1, 28, 28] float32 -> log-probs [B, 10] float32."""
    w1, b1, w2, b2, w3, b3 = params  # bf16 weights (lane-padded), f32 biases
    B = x_nchw.shape[0]

    # Flatten (x.view(x.shape[0], -1)); keep f32, pad batch only.
    x = x_nchw.reshape(B, -1)
    tb, Bp = _choose_tile(B, tile_b)
    if Bp != B:
        x = jnp.pad(x, ((0, Bp - B), (0, 0)))

    grid = (Bp // tb,)

    # Constant index_map -> weights/biases stay resident in VMEM across steps.
    resident = lambda shape: pl.BlockSpec(shape, lambda i: (0,) * len(shape))

    flops = 2 * Bp * (IN_F * H1_P + H1_P * H2_P + H2_P * OUT_P)
    bytes_accessed = (
        Bp * IN_F * 4                                         # f32 input
        + (w1.size + w2.size + w3.size) * 2                   # bf16 weights
        + (b1.size + b2.size + b3.size) * 4                   # f32 biases
        + Bp * OUT_P * 4                                      # f32 output
    )

    out = pl.pallas_call(
        mlp_kernel,
        out_shape=jax.ShapeDtypeStruct((Bp, OUT_P), jnp.float32),
        grid=grid,
        in_specs=[
            pl.BlockSpec((tb, IN_F), lambda i: (i, 0)),   # x: tiled over batch
            resident((IN_F, H1_P)), resident((1, H1_P)),  # weights/biases stay
            resident((H1_P, H2_P)), resident((1, H2_P)),  # resident in VMEM
            resident((H2_P, OUT_P)), resident((1, OUT_P)),
        ],
        out_specs=pl.BlockSpec((tb, OUT_P), lambda i: (i, 0)),
        compiler_params=pltpu.CompilerParams(
            dimension_semantics=("parallel",),            # megacore / v7x TCs
            vmem_limit_bytes=64 * 1024 * 1024,
        ),
        cost_estimate=pl.CostEstimate(
            flops=flops, transcendentals=Bp * OUT_P, bytes_accessed=bytes_accessed
        ),
    )(x, w1, b1, w2, b2, w3, b3)

    # Slice away batch padding and padded logit lanes.
    return out[:B, :OUT_F]


def init_params(key):
    """Deterministic synthetic params, same distributions/shapes as PyTorch's
    nn.Linear (uniform +-1/sqrt(fan_in)).  Weights are stored [in, out]
    (transpose of nn.Linear).  w1 keeps K = 784 un-padded (matches the raw f32
    input fed to the kernel); all output dims and downstream K dims are zero-
    padded to lane multiples.  bf16 weights, f32 biases."""
    ks = jax.random.split(key, 6)

    def linear(kw, kb, fan_in, fan_out, in_pad, out_pad):
        bound = 1.0 / jnp.sqrt(fan_in)
        w = jax.random.uniform(kw, (fan_in, fan_out), jnp.float32, -bound, bound)
        b = jax.random.uniform(kb, (1, fan_out), jnp.float32, -bound, bound)
        w = jnp.pad(w, ((0, in_pad - fan_in), (0, out_pad - fan_out)))
        b = jnp.pad(b, ((0, 0), (0, out_pad - fan_out)))
        return w.astype(jnp.bfloat16), b  # bf16 weights, f32 biases

    w1, b1 = linear(ks[0], ks[1], IN_F, H1_F, IN_F, H1_P)   # K un-padded: 784
    w2, b2 = linear(ks[2], ks[3], H1_F, H2_F, H1_P, H2_P)
    w3, b3 = linear(ks[4], ks[5], H2_F, OUT_F, H2_P, OUT_P)
    return (w1, b1, w2, b2, w3, b3)


def reference_forward(x_nchw, params):
    """Plain-JAX reference (un-padded math, f32) for a sanity check."""
    w1, b1, w2, b2, w3, b3 = params
    w1 = w1[:IN_F, :H1_F].astype(jnp.float32)
    w2 = w2[:H1_F, :H2_F].astype(jnp.float32)
    w3 = w3[:H2_F, :OUT_F].astype(jnp.float32)
    b1, b2, b3 = b1[:, :H1_F], b2[:, :H2_F], b3[:, :OUT_F]
    x = x_nchw.reshape(x_nchw.shape[0], -1)
    h1 = jnp.maximum(x @ w1 + b1, 0.0)
    h2 = jnp.maximum(h1 @ w2 + b2, 0.0)
    logits = h2 @ w3 + b3
    return jax.nn.log_softmax(logits, axis=-1)


if __name__ == "__main__":
    key = jax.random.PRNGKey(0)
    k_x, k_p = jax.random.split(key)

    B = 8
    x = jax.random.normal(k_x, (B, 1, 28, 28), jnp.float32)  # NCHW, like MNIST
    params = init_params(k_p)

    out = t_model_forward(x, params)
    out = jax.block_until_ready(out)

    # sanity: shape, log_softmax rows must sum (in prob space) to ~1
    assert out.shape == (B, 10), out.shape
    row_sums = jnp.sum(jnp.exp(out), axis=1)
    assert jnp.allclose(row_sums, 1.0, atol=1e-4), row_sums

    # sanity vs. plain-JAX reference (bf16 matmuls -> loose tolerance)
    ref = reference_forward(x, params)
    assert jnp.allclose(out, ref, atol=1e-1), jnp.max(jnp.abs(out - ref))

    print("KERNEL_OK")
</pallas_src>

<mosaic_0001>
module attributes {stable_mosaic.version = 11 : i64} {
  func.func @mlp_kernel(%arg0: i32, %arg1: memref<8x784xf32, #tpu.memory_space<vmem>>, %arg2: memref<784x256xbf16, #tpu.memory_space<vmem>>, %arg3: memref<1x256xf32, #tpu.memory_space<vmem>>, %arg4: memref<256x128xbf16, #tpu.memory_space<vmem>>, %arg5: memref<1x128xf32, #tpu.memory_space<vmem>>, %arg6: memref<128x128xbf16, #tpu.memory_space<vmem>>, %arg7: memref<1x128xf32, #tpu.memory_space<vmem>>, %arg8: memref<8x128xf32, #tpu.memory_space<vmem>>) attributes {dimension_semantics = [#tpu.dimension_semantics<parallel>], iteration_bounds = array<i64: 1>, scalar_prefetch = 0 : i64, scratch_operands = 0 : i64, tpu.core_type = #tpu.core_type<tc>, window_params = [{transform_indices = @transform_0, window_bounds = array<i64: 8, 784>}, {pipeline_mode = #tpu.pipeline_mode<synchronous>, transform_indices = @transform_1, window_bounds = array<i64: 784, 256>}, {pipeline_mode = #tpu.pipeline_mode<synchronous>, transform_indices = @transform_2, window_bounds = array<i64: 1, 256>}, {pipeline_mode = #tpu.pipeline_mode<synchronous>, transform_indices = @transform_3, window_bounds = array<i64: 256, 128>}, {pipeline_mode = #tpu.pipeline_mode<synchronous>, transform_indices = @transform_4, window_bounds = array<i64: 1, 128>}, {pipeline_mode = #tpu.pipeline_mode<synchronous>, transform_indices = @transform_5, window_bounds = array<i64: 128, 128>}, {pipeline_mode = #tpu.pipeline_mode<synchronous>, transform_indices = @transform_6, window_bounds = array<i64: 1, 128>}, {transform_indices = @transform_7, window_bounds = array<i64: 8, 128>}]} {
    %c0 = arith.constant 0 : index
    %c0_0 = arith.constant 0 : index
    %0 = vector.load %arg1[%c0, %c0_0] : memref<8x784xf32, #tpu.memory_space<vmem>>, vector<8x784xf32>
    %1 = arith.truncf %0 : vector<8x784xf32> to vector<8x784xbf16>
    %c0_1 = arith.constant 0 : index
    %c0_2 = arith.constant 0 : index
    %2 = vector.load %arg2[%c0_1, %c0_2] : memref<784x256xbf16, #tpu.memory_space<vmem>>, vector<784x256xbf16>
    %cst = arith.constant dense<0.000000e+00> : vector<8x256xf32>
    %3 = tpu.matmul %1, %2, %cst {dimension_numbers = #tpu.dot_dimension_numbers<[1], [0], [0], [1], [0, 0, 1, 1], [], []>} : vector<8x784xbf16>, vector<784x256xbf16>, vector<8x256xf32> -> vector<8x256xf32>
    %c0_3 = arith.constant 0 : index
    %c0_4 = arith.constant 0 : index
    %4 = vector.load %arg3[%c0_3, %c0_4] : memref<1x256xf32, #tpu.memory_space<vmem>>, vector<1x256xf32>
    %5 = vector.broadcast %4 : vector<1x256xf32> to vector<8x256xf32>
    %6 = arith.addf %3, %5 : vector<8x256xf32>
    %cst_5 = arith.constant 0.000000e+00 : f32
    %7 = vector.broadcast %cst_5 : f32 to vector<8x256xf32>
    %8 = arith.maximumf %6, %7 : vector<8x256xf32>
    %9 = arith.truncf %8 : vector<8x256xf32> to vector<8x256xbf16>
    %c0_6 = arith.constant 0 : index
    %c0_7 = arith.constant 0 : index
    %10 = vector.load %arg4[%c0_6, %c0_7] : memref<256x128xbf16, #tpu.memory_space<vmem>>, vector<256x128xbf16>
    %cst_8 = arith.constant dense<0.000000e+00> : vector<8x128xf32>
    %11 = tpu.matmul %9, %10, %cst_8 {dimension_numbers = #tpu.dot_dimension_numbers<[1], [0], [0], [1], [0, 0, 1, 1], [], []>} : vector<8x256xbf16>, vector<256x128xbf16>, vector<8x128xf32> -> vector<8x128xf32>
    %c0_9 = arith.constant 0 : index
    %c0_10 = arith.constant 0 : index
    %12 = vector.load %arg5[%c0_9, %c0_10] : memref<1x128xf32, #tpu.memory_space<vmem>>, vector<1x128xf32>
    %13 = vector.broadcast %12 : vector<1x128xf32> to vector<8x128xf32>
    %14 = arith.addf %11, %13 : vector<8x128xf32>
    %cst_11 = arith.constant 0.000000e+00 : f32
    %15 = vector.broadcast %cst_11 : f32 to vector<8x128xf32>
    %16 = arith.maximumf %14, %15 : vector<8x128xf32>
    %17 = arith.truncf %16 : vector<8x128xf32> to vector<8x128xbf16>
    %c0_12 = arith.constant 0 : index
    %c0_13 = arith.constant 0 : index
    %18 = vector.load %arg6[%c0_12, %c0_13] : memref<128x128xbf16, #tpu.memory_space<vmem>>, vector<128x128xbf16>
    %cst_14 = arith.constant dense<0.000000e+00> : vector<8x128xf32>
    %19 = tpu.matmul %17, %18, %cst_14 {dimension_numbers = #tpu.dot_dimension_numbers<[1], [0], [0], [1], [0, 0, 1, 1], [], []>} : vector<8x128xbf16>, vector<128x128xbf16>, vector<8x128xf32> -> vector<8x128xf32>
    %c0_15 = arith.constant 0 : index
    %c0_16 = arith.constant 0 : index
    %20 = vector.load %arg7[%c0_15, %c0_16] : memref<1x128xf32, #tpu.memory_space<vmem>>, vector<1x128xf32>
    %21 = vector.broadcast %20 : vector<1x128xf32> to vector<8x128xf32>
    %22 = arith.addf %19, %21 : vector<8x128xf32>
    %23 = tpu.iota {dimensions = array<i32: 1>} : vector<8x128xi32>
    %c10_i32 = arith.constant 10 : i32
    %24 = vector.broadcast %c10_i32 : i32 to vector<8x128xi32>
    %25 = arith.cmpi slt, %23, %24 : vector<8x128xi32>
    %cst_17 = arith.constant -1.000000e+30 : f32
    %26 = vector.broadcast %cst_17 : f32 to vector<8x128xf32>
    %27 = arith.select %25, %22, %26 : vector<8x128xi1>, vector<8x128xf32>
    %cst_18 = arith.constant dense<0xFF800000> : vector<8xf32>
    %28 = vector.multi_reduction <maximumf>, %27, %cst_18 [1] : vector<8x128xf32> to vector<8xf32>
    %29 = vector.shape_cast %28 : vector<8xf32> to vector<8x1xf32>
    %30 = vector.broadcast %29 : vector<8x1xf32> to vector<8x128xf32>
    %31 = arith.subf %27, %30 : vector<8x128xf32>
    %32 = math.exp %31 : vector<8x128xf32>
    %cst_19 = arith.constant dense<0.000000e+00> : vector<8xf32>
    %33 = vector.multi_reduction <add>, %32, %cst_19 [1] : vector<8x128xf32> to vector<8xf32>
    %34 = vector.shape_cast %33 : vector<8xf32> to vector<8x1xf32>
    %35 = math.log %34 : vector<8x1xf32>
    %36 = vector.broadcast %35 : vector<8x1xf32> to vector<8x128xf32>
    %37 = arith.subf %31, %36 : vector<8x128xf32>
    %c0_20 = arith.constant 0 : index
    %c0_21 = arith.constant 0 : index
    %38 = vector.load %arg8[%c0_20, %c0_21] : memref<8x128xf32, #tpu.memory_space<vmem>>, vector<8x128xf32>
    tpu.vector_store %arg8[%c0_20, %c0_21], %37 {strides = array<i32>} : memref<8x128xf32, #tpu.memory_space<vmem>>, vector<8x128xf32>,
    return
  }
  func.func @transform_0(%arg0: i32) -> (i32, i32) {
    %c0_i32 = arith.constant 0 : i32
    %c0_i32_0 = arith.constant 0 : i32
    return %arg0, %c0_i32 : i32, i32
  }
  func.func @transform_1(%arg0: i32) -> (i32, i32) {
    %c0_i32 = arith.constant 0 : i32
    %c0_i32_0 = arith.constant 0 : i32
    %c0_i32_1 = arith.constant 0 : i32
    return %c0_i32, %c0_i32_0 : i32, i32
  }
  func.func @transform_2(%arg0: i32) -> (i32, i32) {
    %c0_i32 = arith.constant 0 : i32
    %c0_i32_0 = arith.constant 0 : i32
    %c0_i32_1 = arith.constant 0 : i32
    return %c0_i32, %c0_i32_0 : i32, i32
  }
  func.func @transform_3(%arg0: i32) -> (i32, i32) {
    %c0_i32 = arith.constant 0 : i32
    %c0_i32_0 = arith.constant 0 : i32
    %c0_i32_1 = arith.constant 0 : i32
    return %c0_i32, %c0_i32_0 : i32, i32
  }
  func.func @transform_4(%arg0: i32) -> (i32, i32) {
    %c0_i32 = arith.constant 0 : i32
    %c0_i32_0 = arith.constant 0 : i32
    %c0_i32_1 = arith.constant 0 : i32
    return %c0_i32, %c0_i32_0 : i32, i32
  }
  func.func @transform_5(%arg0: i32) -> (i32, i32) {
    %c0_i32 = arith.constant 0 : i32
    %c0_i32_0 = arith.constant 0 : i32
    %c0_i32_1 = arith.constant 0 : i32
    return %c0_i32, %c0_i32_0 : i32, i32
  }
  func.func @transform_6(%arg0: i32) -> (i32, i32) {
    %c0_i32 = arith.constant 0 : i32
    %c0_i32_0 = arith.constant 0 : i32
    %c0_i32_1 = arith.constant 0 : i32
    return %c0_i32, %c0_i32_0 : i32, i32
  }
  func.func @transform_7(%arg0: i32) -> (i32, i32) {
    %c0_i32 = arith.constant 0 : i32
    %c0_i32_0 = arith.constant 0 : i32
    return %arg0, %c0_i32 : i32, i32
  }
}

</mosaic_0001>

<bundles_post_ra>
// kernel: t_model_forward.1
= control target key start
LH: loop header
LB: loop body
LE: loop exit
PB: predicated region body
PF: predicated region fallthrough
CT: control target
= control target key end

     0   :  { %12 = vsyncpa [#allocation3], 0  ;;  %s1977_s0 = inlined_call_operand.vmem [shape: f32[8,784], index: 0, kind: input, shape index: {}]   ;;  %s1978_s1 = inlined_call_operand.vmem [shape: bf16[784,256], index: 1, kind: input, shape index: {}]   ;;  %s1979_s2 = inlined_call_operand.vmem [shape: f32[1,256], index: 2, kind: input, shape index: {}]   ;;  %s1980_s3 = inlined_call_operand.hbm [shape: bf16[256,128], index: 3, kind: input, shape index: {}]   ;;  %s1981_s4 = inlined_call_operand.vmem [shape: f32[1,128], index: 4, kind: input, shape index: {}]   ;;  %s1982_s5 = inlined_call_operand.hbm [shape: bf16[128,128], index: 5, kind: input, shape index: {}]   ;;  %s1983_s6 = inlined_call_operand.vmem [shape: f32[1,128], index: 6, kind: input, shape index: {}]   ;;  %s1984_s7 = inlined_call_operand.hbm [shape: f32[8,128], index: 7, kind: output, shape index: {}]  }
   0x1   :  { %13 = vsyncpa [#allocation6], 0 }
   0x2   :  { %14 = vsyncpa [#allocation4], 0  ;;  %s1586_s24 = smov [#allocation2]  }
   0x3   :  { %s26_s25 = sshll.u32 %s1586_s24, 4  ;;  %s27_s25 = int_to_ptr.vmem [resolvable:$true] %s26_s25 }
   0x4   :  { %s1528_s26 = scalar_lea.vmem %s27_s25, 2048  ;;  %p1533_p1 = scmp.lt.s32.totalorder %s27_s25, %s27_s25 }
   0x5   :  { %p1529_p0 = scmp.ne.s32.totalorder %s27_s25, %s1528_s26  ;;  %p1534_p2 = scmp.lt.s32.totalorder %s1528_s26, %s1528_s26 }
   0x7   :  { %p1535_p3 = por %p1534_p2, %p1533_p1 }
   0x9   :  { %p1536_p4 = pnand %p1535_p3, %p1529_p0 }
   0xb   :  { %1539 = shalt.err (!%p1536_p4)
}
   0xc   :  { %s1587_s27 = smov 64   ;;  %s1588_s28 = smov 4  }
   0xd   :  { %32 = dma.hbm_to_vmem [thread:$0]  %s1980_s3, 2048, %s27_s25, [#allocation3], %s1587_s27, %s1587_s27, %s1588_s28  }
   0xe   :  { %s1589_s8 = smov [#allocation5]  }
   0xf   :  { %s40_s9 = sshll.u32 %s1589_s8, 4  ;;  %s41_s9 = int_to_ptr.vmem [resolvable:$true] %s40_s9 }
  0x10   :  { %s1548_s10 = scalar_lea.vmem %s41_s9, 1024  ;;  %p1553_p6 = scmp.lt.s32.totalorder %s41_s9, %s41_s9 }
  0x11   :  { %p1549_p5 = scmp.ne.s32.totalorder %s41_s9, %s1548_s10  ;;  %p1554_p7 = scmp.lt.s32.totalorder %s1548_s10, %s1548_s10 }
  0x13   :  { %p1555_p8 = por %p1554_p7, %p1553_p6 }
  0x15   :  { %p1556_p9 = pnand %p1555_p8, %p1549_p5 }
  0x17   :  { %1559 = shalt.err (!%p1556_p9)
}
  0x18   :  { %46 = dma.hbm_to_vmem [thread:$0]  %s1982_s5, 1024, %s41_s9, [#allocation6], %s1587_s27, %s1587_s27, %s1588_s28  }
  0x19   :  { %1580 = dma.done.wait [#allocation3], 2048  }
  0x1a   :  { %1581 = vsyncadd [#allocation3], 4294965248 }
  0x1b   :  { %1582 = dma.done.wait [#allocation6], 1024  }
  0x1c   :  { %1583 = vsyncadd [#allocation6], 4294966272  ;;  %v1345_v0 = vld [vmem:[%s1978_s1 + $0x74] ss:$8 sps:$4 sm:$0xff]   ;;  %v1347_v1 = vld [vmem:[%s1978_s1 + $0x70] ss:$8 sps:$4 sm:$0xff]  }
  0x1d   :  { %674 = vmatprep.subr.bf16.mxu0 %v1345_v0  ;;  %v1348_v2 = vld [vmem:[%s1978_s1 + $0x174] ss:$8 sps:$4 sm:$0xff]   ;;  %v1350_v3 = vld [vmem:[%s1978_s1 + $0x170] ss:$8 sps:$4 sm:$0xff]   ;;  %v1351_v4 = vld [vmem:[%s1978_s1 + $0x64] ss:$8 sps:$4 sm:$0xff]  }
  0x1e   :  { %675 = vmatpush1.bf16.msra.mxu0 %v1347_v1  ;;  %v1353_v5 = vld [vmem:[%s1978_s1 + $0x60] ss:$8 sps:$4 sm:$0xff]   ;;  %715 = vmatprep.subr.bf16.mxu1 %v1348_v2  ;;  %v1354_v6 = vld [vmem:[%s1978_s1 + $0x164] ss:$8 sps:$4 sm:$0xff]   ;;  %v1357_v8 = vld [vmem:[%s1978_s1 + $0x54] ss:$8 sps:$4 sm:$0xff]  }
  0x1f   :  { %716 = vmatpush1.bf16.msra.mxu1 %v1350_v3  ;;  %676 = vmatprep.subr.bf16.mxu0 %v1351_v4  ;;  %v1356_v7 = vld [vmem:[%s1978_s1 + $0x160] ss:$8 sps:$4 sm:$0xff]   ;;  %v1359_v9 = vld [vmem:[%s1978_s1 + $0x50] ss:$8 sps:$4 sm:$0xff]   ;;  %v1360_v10 = vld [vmem:[%s1978_s1 + $0x154] ss:$8 sps:$4 sm:$0xff]  }
  0x20   :  { %717 = vmatprep.subr.bf16.mxu1 %v1354_v6  ;;  %v1363_v11 = vld [vmem:[%s1978_s1 + $0x44] ss:$8 sps:$4 sm:$0xff]   ;;  %v1362_v12 = vld [vmem:[%s1978_s1 + $0x150] ss:$8 sps:$4 sm:$0xff]   ;;  %v1365_v14 = vld [vmem:[%s1978_s1 + $0x40] ss:$8 sps:$4 sm:$0xff]  }
  0x21   :  { %v1366_v13 = vld [vmem:[%s1978_s1 + $0x144] ss:$8 sps:$4 sm:$0xff]   ;;  %v1369_v15 = vld [vmem:[%s1978_s1 + $0x34] ss:$8 sps:$4 sm:$0xff]   ;;  %v1368_v16 = vld [vmem:[%s1978_s1 + $0x140] ss:$8 sps:$4 sm:$0xff]  }
  0x22   :  { %677 = vmatpush1.bf16.msra.mxu0 %v1353_v5  ;;  %v1372_v17 = vld [vmem:[%s1978_s1 + $0x134] ss:$8 sps:$4 sm:$0xff]   ;;  %v1371_v18 = vld [vmem:[%s1978_s1 + $0x30] ss:$8 sps:$4 sm:$0xff]   ;;  %v1375_v19 = vld [vmem:[%s1978_s1 + $0x24] ss:$8 sps:$4 sm:$0xff]  }
  0x23   :  { %678 = vmatprep.subr.bf16.mxu0 %v1357_v8  ;;  %718 = vmatpush1.bf16.msra.mxu1 %v1356_v7  ;;  %v1374_v20 = vld [vmem:[%s1978_s1 + $0x130] ss:$8 sps:$4 sm:$0xff]   ;;  %v1378_v21 = vld [vmem:[%s1978_s1 + $0x124] ss:$8 sps:$4 sm:$0xff]   ;;  %v1377_v22 = vld [vmem:[%s1978_s1 + $0x20] ss:$8 sps:$4 sm:$0xff]  }
  0x24   :  { %719 = vmatprep.subr.bf16.mxu1 %v1360_v10  ;;  %v1381_v23 = vld [vmem:[%s1978_s1 + $0x14] ss:$8 sps:$4 sm:$0xff]   ;;  %v1380_v24 = vld [vmem:[%s1978_s1 + $0x120] ss:$8 sps:$4 sm:$0xff]   ;;  %v1383_v26 = vld [vmem:[%s1978_s1 + $0x10] ss:$8 sps:$4 sm:$0xff]  }
  0x25   :  { %v1384_v25 = vld [vmem:[%s1978_s1 + $0x114] ss:$8 sps:$4 sm:$0xff]   ;;  %v1387_v27 = vld [vmem:[%s1978_s1 + $0x4] ss:$8 sps:$4 sm:$0xff]   ;;  %v1386_v28 = vld [vmem:[%s1978_s1 + $0x110] ss:$8 sps:$4 sm:$0xff]  }
  0x26   :  { %679 = vmatpush1.bf16.msra.mxu0 %v1359_v9  ;;  %v1390_v29 = vld [vmem:[%s1978_s1 + $0x104] ss:$8 sps:$4 sm:$0xff]   ;;  %v1389_v30 = vld [vmem:[%s1978_s1] ss:$8 sps:$4 sm:$0xff]   ;;  %v1393_v31 = vld [vmem:[%s1978_s1 + $0xf4] ss:$8 sps:$4 sm:$0xff]  }
  0x27   :  { %680 = vmatprep.subr.bf16.mxu0 %v1363_v11  ;;  %720 = vmatpush1.bf16.msra.mxu1 %v1362_v12  ;;  %v1392_v32 = vld [vmem:[%s1978_s1 + $0x100] ss:$8 sps:$4 sm:$0xff]   ;;  %v1396_v33 = vld [vmem:[%s1978_s1 + $0x1f4] ss:$8 sps:$4 sm:$0xff]   ;;  %v1395_v34 = vld [vmem:[%s1978_s1 + $0xf0] ss:$8 sps:$4 sm:$0xff]  }
  0x28   :  { %721 = vmatprep.subr.bf16.mxu1 %v1366_v13  ;;  %v1399_v35 = vld [vmem:[%s1978_s1 + $0xe4] ss:$8 sps:$4 sm:$0xff]   ;;  %v1398_v36 = vld [vmem:[%s1978_s1 + $0x1f0] ss:$8 sps:$4 sm:$0xff]   ;;  %v1401_v38 = vld [vmem:[%s1978_s1 + $0xe0] ss:$8 sps:$4 sm:$0xff]  }
  0x29   :  { %v1402_v37 = vld [vmem:[%s1978_s1 + $0x1e4] ss:$8 sps:$4 sm:$0xff]   ;;  %v1405_v39 = vld [vmem:[%s1978_s1 + $0xd4] ss:$8 sps:$4 sm:$0xff]   ;;  %v1404_v40 = vld [vmem:[%s1978_s1 + $0x1e0] ss:$8 sps:$4 sm:$0xff]  }
  0x2a   :  { %681 = vmatpush1.bf16.msra.mxu0 %v1365_v14  ;;  %v1408_v41 = vld [vmem:[%s1978_s1 + $0x1d4] ss:$8 sps:$4 sm:$0xff]   ;;  %v1407_v42 = vld [vmem:[%s1978_s1 + $0xd0] ss:$8 sps:$4 sm:$0xff]   ;;  %v1411_v43 = vld [vmem:[%s1978_s1 + $0xc4] ss:$8 sps:$4 sm:$0xff]  }
  0x2b   :  { %682 = vmatprep.subr.bf16.mxu0 %v1369_v15  ;;  %722 = vmatpush1.bf16.msra.mxu1 %v1368_v16  ;;  %v1410_v44 = vld [vmem:[%s1978_s1 + $0x1d0] ss:$8 sps:$4 sm:$0xff]   ;;  %v1414_v45 = vld [vmem:[%s1978_s1 + $0x1c4] ss:$8 sps:$4 sm:$0xff]   ;;  %v1413_v47 = vld [vmem:[%s1978_s1 + $0xc0] ss:$8 sps:$4 sm:$0xff]  }
  0x2c   :  { %723 = vmatprep.subr.bf16.mxu1 %v1372_v17  ;;  %v57_v46 = vld [vmem:[%s1977_s0 + $0x8] sm:$0xff]  ;;  %v1417_v49 = vld [vmem:[%s1978_s1 + $0xb4] ss:$8 sps:$4 sm:$0xff]   ;;  %v1419_v54 = vld [vmem:[%s1978_s1 + $0xb0] ss:$8 sps:$4 sm:$0xff]   ;;  %vm670_vm0 = vcmask 130048  }
  0x2d   :  { %v64_v48 = vpack.c.bf16 %v57_v46, %v57_v46  ;;  %v59_v50 = vld [vmem:[%s1977_s0 + $0x18] sm:$0xff]  ;;  %v1416_v51 = vld [vmem:[%s1978_s1 + $0x1c0] ss:$8 sps:$4 sm:$0xff]   ;;  %v1423_v55 = vld [vmem:[%s1978_s1 + $0xa4] ss:$8 sps:$4 sm:$0xff]   ;;  %vm1592_vm1 = vmmov 0  }
  0x2e   :  { %683 = vmatpush1.bf16.msra.mxu0 %v1371_v18  ;;  %v66_v52 = vpack.c.bf16 %v59_v50, %v59_v50  ;;  %v1420_v53 = vld [vmem:[%s1978_s1 + $0x1b4] ss:$8 sps:$4 sm:$0xff]   ;;  %v1422_v56 = vld [vmem:[%s1978_s1 + $0x1b0] ss:$8 sps:$4 sm:$0xff]   ;;  %v1426_v57 = vld [vmem:[%s1978_s1 + $0x1a4] ss:$8 sps:$4 sm:$0xff]  }
  0x2f   :  { %684 = vmatprep.subr.bf16.mxu0 %v1375_v19  ;;  %724 = vmatpush1.bf16.msra.mxu1 %v1374_v20  ;;  %v1425_v58 = vld [vmem:[%s1978_s1 + $0xa0] ss:$8 sps:$4 sm:$0xff]   ;;  %v1429_v59 = vld [vmem:[%s1978_s1 + $0x94] ss:$8 sps:$4 sm:$0xff]   ;;  %v1431_v62 = vld [vmem:[%s1978_s1 + $0x90] ss:$8 sps:$4 sm:$0xff]  }
  0x30   :  { %725 = vmatprep.subr.bf16.mxu1 %v1378_v21  ;;  %706 = vmatprep.mubr.bf16.mxu0 %v64_v48  ;;  %v1428_v60 = vld [vmem:[%s1978_s1 + $0x1a0] ss:$8 sps:$4 sm:$0xff]   ;;  %v1432_v61 = vld [vmem:[%s1978_s1 + $0x194] ss:$8 sps:$4 sm:$0xff]   ;;  %v1435_v63 = vld [vmem:[%s1978_s1 + $0x84] ss:$8 sps:$4 sm:$0xff]  }
  0x31   :  { %747 = vmatprep.mubr.bf16.mxu1 %v66_v52  ;;  %v1434_v0 = vld [vmem:[%s1978_s1 + $0x190] ss:$8 sps:$4 sm:$0xff]   ;;  %v1437_v1 = vld [vmem:[%s1978_s1 + $0x80] ss:$8 sps:$4 sm:$0xff]   ;;  %v1438_v2 = vld [vmem:[%s1978_s1 + $0x184] ss:$8 sps:$4 sm:$0xff]  }
  0x32   :  { %685 = vmatpush1.bf16.msra.mxu0 %v1377_v22  ;;  %v1440_v3 = vld [vmem:[%s1978_s1 + $0x180] ss:$8 sps:$4 sm:$0xff]   ;;  %v1443_v5 = vld [vmem:[%s1978_s1 + $0x274] ss:$8 sps:$4 sm:$0xff]   ;;  %v1441_v8 = vld [vmem:[%s1978_s1 + $0x270] ss:$8 sps:$4 sm:$0xff]  }
  0x33   :  { %686 = vmatprep.subr.bf16.mxu0 %v1381_v23  ;;  %726 = vmatpush1.bf16.msra.mxu1 %v1380_v24  ;;  %v56_v4 = vld [vmem:[%s1977_s0] sm:$0xff]  ;;  %v58_v6 = vld [vmem:[%s1977_s0 + $0x10] sm:$0xff]  ;;  %v61_v16 = vld [vmem:[%s1977_s0 + $0x28] sm:$0xff]  ;;  %v1590_v19 = vmov 0  }
  0x34   :  { %727 = vmatprep.subr.bf16.mxu1 %v1384_v25  ;;  %v63_v7 = vpack.c.bf16 %v56_v4, %v56_v4  ;;  %v1446_v9 = vld [vmem:[%s1978_s1 + $0x264] ss:$8 sps:$4 sm:$0xff]   ;;  %v65_v10 = vpack.c.bf16 %v58_v6, %v58_v6  ;;  %v1486_v11 = vld [vmem:[%s1978_s1 + $0x300] ss:$8 sps:$4 sm:$0xff]   ;;  %v1449_v14 = vld [vmem:[%s1978_s1 + $0x254] ss:$8 sps:$4 sm:$0xff]   ;;  %v68_v17 = vpack.c.bf16 %v61_v16, %v61_v16 }
  0x35   :  { %v1488_v12 = vld [vmem:[%s1978_s1 + $0x304] ss:$8 sps:$4 sm:$0xff]   ;;  %v1444_v13 = vld [vmem:[%s1978_s1 + $0x260] ss:$8 sps:$4 sm:$0xff]   ;;  %v62_v15 = vld [vmem:[%s1977_s0 + $0x30] sm:$0xff] }
  0x36   :  { %687 = vmatpush1.bf16.msra.mxu0 %v1383_v26  ;;  %v1447_v18 = vld [vmem:[%s1978_s1 + $0x250] ss:$8 sps:$4 sm:$0xff]   ;;  %v1452_v20 = vld [vmem:[%s1978_s1 + $0x244] ss:$8 sps:$4 sm:$0xff]   ;;  %v69_v21 = vpack.c.bf16 %v62_v15, %v62_v15  ;;  %v1450_v22 = vld [vmem:[%s1978_s1 + $0x240] ss:$8 sps:$4 sm:$0xff]  }
  0x37   :  { %688 = vmatprep.subr.bf16.mxu0 %v1387_v27  ;;  %728 = vmatpush1.bf16.msra.mxu1 %v1386_v28  ;;  %v1455_v23 = vld [vmem:[%s1978_s1 + $0x234] ss:$8 sps:$4 sm:$0xff]   ;;  %v1453_v24 = vld [vmem:[%s1978_s1 + $0x230] ss:$8 sps:$4 sm:$0xff]   ;;  %v1458_v25 = vld [vmem:[%s1978_s1 + $0x224] ss:$8 sps:$4 sm:$0xff]  }
  0x38   :  { %729 = vmatprep.subr.bf16.mxu1 %v1390_v29  ;;  %v1456_v26 = vld [vmem:[%s1978_s1 + $0x220] ss:$8 sps:$4 sm:$0xff]   ;;  %v1461_v27 = vld [vmem:[%s1978_s1 + $0x214] ss:$8 sps:$4 sm:$0xff]   ;;  %v1459_v28 = vld [vmem:[%s1978_s1 + $0x210] ss:$8 sps:$4 sm:$0xff]  }
  0x39   :  { %v1464_v29 = vld [vmem:[%s1978_s1 + $0x204] ss:$8 sps:$4 sm:$0xff]   ;;  %v1489_v46 = vld [vmem:[%s1978_s1 + $0x280] ss:$8 sps:$4 sm:$0xff]   ;;  %v1493_v50 = vld [vmem:[#allocation2 + $0x38] sm:$0xff]  }
  0x3a   :  { %689 = vmatpush1.bf16.msra.mxu0 %v1389_v30  ;;  %v1462_v30 = vld [vmem:[%s1978_s1 + $0x200] ss:$8 sps:$4 sm:$0xff]   ;;  %v1495_v52 = vld [vmem:[#allocation2 + $0x30] sm:$0xff]  }
  0x3b   :  { %690 = vmatprep.subr.bf16.mxu0 %v1393_v31  ;;  %730 = vmatpush1.bf16.msra.mxu1 %v1392_v32  ;;  %v1467_v31 = vld [vmem:[%s1978_s1 + $0x2f4] ss:$8 sps:$4 sm:$0xff]   ;;  %v1465_v32 = vld [vmem:[%s1978_s1 + $0x2f0] ss:$8 sps:$4 sm:$0xff]  }
  0x3c   :  { %731 = vmatprep.subr.bf16.mxu1 %v1396_v33  ;;  %v1470_v33 = vld [vmem:[%s1978_s1 + $0x2e4] ss:$8 sps:$4 sm:$0xff]  }
  0x3e   :  { %691 = vmatpush2.bf16.msra.mxu0 %v1395_v34  ;;  %v1468_v34 = vld [vmem:[%s1978_s1 + $0x2e0] ss:$8 sps:$4 sm:$0xff]  }
  0x3f   :  { %692 = vmatprep.subr.bf16.mxu0 %v1399_v35  ;;  %732 = vmatpush2.bf16.msra.mxu1 %v1398_v36  ;;  %v1473_v35 = vld [vmem:[%s1978_s1 + $0x2d4] ss:$8 sps:$4 sm:$0xff]   ;;  %v1471_v36 = vld [vmem:[%s1978_s1 + $0x2d0] ss:$8 sps:$4 sm:$0xff]  }
  0x40   :  { %733 = vmatprep.subr.bf16.mxu1 %v1402_v37  ;;  %v1476_v37 = vld [vmem:[%s1978_s1 + $0x2c4] ss:$8 sps:$4 sm:$0xff]  }
  0x42   :  { %693 = vmatpush2.bf16.msra.mxu0 %v1401_v38  ;;  %v1474_v38 = vld [vmem:[%s1978_s1 + $0x2c0] ss:$8 sps:$4 sm:$0xff]  }
  0x43   :  { %694 = vmatprep.subr.bf16.mxu0 %v1405_v39  ;;  %734 = vmatpush2.bf16.msra.mxu1 %v1404_v40  ;;  %v1479_v39 = vld [vmem:[%s1978_s1 + $0x2b4] ss:$8 sps:$4 sm:$0xff]   ;;  %v1477_v40 = vld [vmem:[%s1978_s1 + $0x2b0] ss:$8 sps:$4 sm:$0xff]  }
  0x44   :  { %735 = vmatprep.subr.bf16.mxu1 %v1408_v41  ;;  %v1482_v41 = vld [vmem:[%s1978_s1 + $0x2a4] ss:$8 sps:$4 sm:$0xff]  }
  0x46   :  { %695 = vmatpush2.bf16.msra.mxu0 %v1407_v42  ;;  %v1480_v42 = vld [vmem:[%s1978_s1 + $0x2a0] ss:$8 sps:$4 sm:$0xff]  }
  0x47   :  { %696 = vmatprep.subr.bf16.mxu0 %v1411_v43  ;;  %736 = vmatpush2.bf16.msra.mxu1 %v1410_v44  ;;  %v1485_v43 = vld [vmem:[%s1978_s1 + $0x294] ss:$8 sps:$4 sm:$0xff]   ;;  %v1483_v44 = vld [vmem:[%s1978_s1 + $0x290] ss:$8 sps:$4 sm:$0xff]  }
  0x48   :  { %737 = vmatprep.subr.bf16.mxu1 %v1414_v45  ;;  %v1491_v45 = vld [vmem:[%s1978_s1 + $0x284] ss:$8 sps:$4 sm:$0xff]  }
  0x4a   :  { %697 = vmatpush2.bf16.msra.mxu0 %v1413_v47  ;;  %v60_v47 = vld [vmem:[%s1977_s0 + $0x20] sm:$0xff] }
  0x4b   :  { %698 = vmatprep.subr.bf16.mxu0 %v1417_v49  ;;  %738 = vmatpush2.bf16.msra.mxu1 %v1416_v51  ;;  %v67_v48 = vpack.c.bf16 %v60_v47, %v60_v47  ;;  %v1492_v49 = vld [vmem:[#allocation2 + $0x78] sm:$0xff]   ;;  %v1494_v51 = vld [vmem:[#allocation2 + $0x70] sm:$0xff]  }
  0x4c   :  { %739 = vmatprep.subr.bf16.mxu1 %v1420_v53  ;;  %v1496_v53 = vld [vmem:[#allocation2 + $0x68] sm:$0xff]  }
  0x4e   :  { %699 = vmatpush2.bf16.msra.mxu0 %v1419_v54  ;;  %v1497_v54 = vld [vmem:[#allocation2 + $0x28] sm:$0xff]  }
  0x4f   :  { %700 = vmatprep.subr.bf16.mxu0 %v1423_v55  ;;  %740 = vmatpush2.bf16.msra.mxu1 %v1422_v56  ;;  %v1498_v55 = vld [vmem:[#allocation2 + $0x60] sm:$0xff]  }
  0x50   :  { %741 = vmatprep.subr.bf16.mxu1 %v1426_v57  ;;  %v1499_v56 = vld [vmem:[#allocation2 + $0x20] sm:$0xff]   ;;  %v1500_v57 = vld [vmem:[#allocation2 + $0x58] sm:$0xff]  }
  0x52   :  { %701 = vmatpush2.bf16.msra.mxu0 %v1425_v58  ;;  %v1501_v58 = vld [vmem:[#allocation2 + $0x18] sm:$0xff]  }
  0x53   :  { %702 = vmatprep.subr.bf16.mxu0 %v1429_v59  ;;  %742 = vmatpush2.bf16.msra.mxu1 %v1428_v60  ;;  %v1502_v59 = vld [vmem:[#allocation2 + $0x50] sm:$0xff]  }
  0x54   :  { %743 = vmatprep.subr.bf16.mxu1 %v1432_v61  ;;  %v1503_v60 = vld [vmem:[#allocation2 + $0x10] sm:$0xff]   ;;  %v1504_v61 = vld [vmem:[#allocation2 + $0x48] sm:$0xff]  }
  0x56   :  { %703 = vmatpush2.bf16.msra.mxu0 %v1431_v62  ;;  %v1505_v62 = vld [vmem:[#allocation2 + $0x8] sm:$0xff]  }
  0x57   :  { %704 = vmatprep.subr.bf16.mxu0 %v1435_v63  ;;  %744 = vmatpush2.bf16.msra.mxu1 %v1434_v0  ;;  %v1506_v63 = vld [vmem:[#allocation2 + $0x40] sm:$0xff]  }
  0x58   :  { %745 = vmatprep.subr.bf16.mxu1 %v1438_v2  ;;  %v1507_v0 = vld [vmem:[#allocation2] sm:$0xff]  }
  0x5a   :  { %705 = vmatpush2.bf16.msra.mxu0 %v1437_v1  ;;  %v1591_v1 = vmov 0.0  }
  0x5b   :  { %756 = vmatprep.subr.bf16.mxu0 %v1443_v5  ;;  %746 = vmatpush2.bf16.msra.mxu1 %v1440_v3 }
  0x5c   :  { %811 = vmatprep.subr.bf16.mxu1 %v1488_v12 }
  0x5d   :  { %707 = vmatmul.mubr.bf16.vlgmr.msra.gmra.mxu0 %v63_v7 }
  0x5e   :  { %757 = vmatpush1.bf16.msra.mxu0 %v1441_v8  ;;  %748 = vmatmul.mubr.bf16.vlgmr.msra.gmra.mxu1 %v65_v10 }
  0x5f   :  { %758 = vmatprep.subr.bf16.mxu0 %v1446_v9  ;;  %812 = vmatpush1.bf16.msra.mxu1 %v1486_v11 }
  0x60   :  { %829 = vmatprep.mubr.bf16.mxu1 %v1590_v19  ;;  %788 = vmatprep.mubr.bf16.mxu0 %v68_v17  ;;  %v168_v17 = vld [vmem:[%s1979_s2] sm:$0x3] }
  0x61   :  { %1286 = vmatprep.subr.bf16.mxu1 %v1492_v49 }
  0x62   :  { %759 = vmatpush1.bf16.msra.mxu0 %v1444_v13 }
  0x63   :  { %760 = vmatprep.subr.bf16.mxu0 %v1449_v14  ;;  %v170_v14 = vlaneseq }
  0x65   :  { %v171_v15 = vshrl.u32 %v170_v14, 7 }
  0x66   :  { %761 = vmatpush1.bf16.msra.mxu0 %v1447_v18  ;;  %1259 = vmatmul.mubr.msk.bf16.vlgmr.msra.gmra.mxu1 %vm670_vm0, %v69_v21 }
  0x67   :  { %762 = vmatprep.subr.bf16.mxu0 %v1452_v20  ;;  %1287 = vmatpush3.bf16.msra.mxu1 %v1493_v50  ;;  %v172_v16 = vsub.s32 0, %v171_v15  ;;  %v176_v18 = vsub.s32 1, %v171_v15 }
  0x68   :  { %1288 = vmatprep.subr.bf16.mxu1 %v1494_v51 }
  0x69   :  { %v173_v19 = vrot.slane %v168_v17, %v172_v16  ;;  %v177_v20 = vrot.slane %v168_v17, %v176_v18 }
  0x6a   :  { %763 = vmatpush1.bf16.msra.mxu0 %v1450_v22 }
  0x6b   :  { %764 = vmatprep.subr.bf16.mxu0 %v1455_v23  ;;  %1289 = vmatpush3.bf16.msra.mxu1 %v1495_v52 }
  0x6c   :  { %1290 = vmatprep.subr.bf16.mxu1 %v1496_v53 }
  0x6e   :  { %765 = vmatpush1.bf16.msra.mxu0 %v1453_v24 }
  0x6f   :  { %766 = vmatprep.subr.bf16.mxu0 %v1458_v25  ;;  %1291 = vmatpush3.bf16.msra.mxu1 %v1497_v54  ;;  %v1131_v54 = vand.u32 127, %v170_v14 }
  0x70   :  { %1292 = vmatprep.subr.bf16.mxu1 %v1498_v55  ;;  %v1277_v55 = vld [vmem:[%s1983_s6] ss:$0 sm:$0xff] }
  0x71   :  { %vm1132_vm2 = vcmp.lt.s32.totalorder %v1131_v54, 10 }
  0x72   :  { %767 = vmatpush1.bf16.msra.mxu0 %v1456_v26 }
  0x73   :  { %768 = vmatprep.subr.bf16.mxu0 %v1461_v27  ;;  %1293 = vmatpush3.bf16.msra.mxu1 %v1499_v56 }
  0x74   :  { %1294 = vmatprep.subr.bf16.mxu1 %v1500_v57 }
  0x76   :  { %769 = vmatpush1.bf16.msra.mxu0 %v1459_v28 }
  0x77   :  { %770 = vmatprep.subr.bf16.mxu0 %v1464_v29  ;;  %1295 = vmatpush3.bf16.msra.mxu1 %v1501_v58 }
  0x78   :  { %1296 = vmatprep.subr.bf16.mxu1 %v1502_v59 }
  0x7a   :  { %771 = vmatpush1.bf16.msra.mxu0 %v1462_v30 }
  0x7b   :  { %772 = vmatprep.subr.bf16.mxu0 %v1467_v31  ;;  %1297 = vmatpush3.bf16.msra.mxu1 %v1503_v60 }
  0x7c   :  { %1298 = vmatprep.subr.bf16.mxu1 %v1504_v61 }
  0x7e   :  { %773 = vmatpush2.bf16.msra.mxu0 %v1465_v32 }
  0x7f   :  { %774 = vmatprep.subr.bf16.mxu0 %v1470_v33  ;;  %1299 = vmatpush3.bf16.msra.mxu1 %v1505_v62 }
  0x80   :  { %1300 = vmatprep.subr.bf16.mxu1 %v1506_v63 }
  0x82   :  { %775 = vmatpush2.bf16.msra.mxu0 %v1468_v34 }
  0x83   :  { %776 = vmatprep.subr.bf16.mxu0 %v1473_v35  ;;  %1301 = vmatpush3.bf16.msra.mxu1 %v1507_v0 }
  0x84   :  { %1317 = vmatprep.subr.bf16.mxu1 %v1591_v1 }
  0x86   :  { %777 = vmatpush2.bf16.msra.mxu0 %v1471_v36  ;;  %v1508_v36 = vld [vmem:[#allocation5 + $0x38] sm:$0xff]  }
  0x87   :  { %778 = vmatprep.subr.bf16.mxu0 %v1476_v37 }
  0x8a   :  { %779 = vmatpush2.bf16.msra.mxu0 %v1474_v38  ;;  %v1509_v38 = vld [vmem:[#allocation5 + $0x30] sm:$0xff]  }
  0x8b   :  { %780 = vmatprep.subr.bf16.mxu0 %v1479_v39  ;;  %v1510_v39 = vld [vmem:[#allocation5 + $0x28] sm:$0xff]  }
  0x8e   :  { %781 = vmatpush2.bf16.msra.mxu0 %v1477_v40  ;;  %v1511_v40 = vld [vmem:[#allocation5 + $0x20] sm:$0xff]  }
  0x8f   :  { %782 = vmatprep.subr.bf16.mxu0 %v1482_v41  ;;  %v1512_v41 = vld [vmem:[#allocation5 + $0x18] sm:$0xff]  }
  0x92   :  { %783 = vmatpush2.bf16.msra.mxu0 %v1480_v42  ;;  %v1513_v42 = vld [vmem:[#allocation5 + $0x10] sm:$0xff]  }
  0x93   :  { %784 = vmatprep.subr.bf16.mxu0 %v1485_v43  ;;  %v1514_v43 = vld [vmem:[#allocation5 + $0x8] sm:$0xff]  }
  0x96   :  { %785 = vmatpush2.bf16.msra.mxu0 %v1483_v44  ;;  %v1515_v44 = vld [vmem:[#allocation5] sm:$0xff]  }
  0x97   :  { %786 = vmatprep.subr.bf16.mxu0 %v1491_v45 }
  0x9a   :  { %787 = vmatpush2.bf16.msra.mxu0 %v1489_v46  ;;  %v1260_v46 = vld [vmem:[%s1981_s4] ss:$0 sm:$0xff]  ;;  %s1593_s4 = smov [#allocation7]  }
  0x9b   :  { %s1151_s24 = sshll.u32 %s1593_s4, 4  ;;  %s1152_s24 = int_to_ptr.vmem [resolvable:$true] %s1151_s24 }
  0x9c   :  { %s1560_s6 = scalar_lea.vmem %s1152_s24, 128  ;;  %p1565_p11 = scmp.lt.s32.totalorder %s1152_s24, %s1152_s24 }
  0x9d   :  { %789 = vmatmul.mubr.bf16.vlgmr.msra.gmra.mxu0 %v67_v48  ;;  %p1561_p10 = scmp.ne.s32.totalorder %s1152_s24, %s1560_s6  ;;  %p1566_p12 = scmp.lt.s32.totalorder %s1560_s6, %s1560_s6 }
  0x9f   :  { %p1567_p13 = por %p1566_p12, %p1565_p11 }
  0xa1   :  { %p1568_p0 = pnand %p1567_p13, %p1561_p10 }
 0x11d   :  { %v708_v2 = vpop.f32.mrf.mxu0 }
 0x11e   :  { %v749_v4 = vpop.f32.mrf.mxu1  ;;  %v709_v21 = vadd.f32 %v708_v2, %v173_v19 }
 0x11f   :  { %v710_v3 = vpop.f32.mrf.mxu0 }
 0x120   :  { %v751_v6 = vpop.f32.mrf.mxu1  ;;  %v711_v22 = vadd.f32 %v710_v3, %v177_v20  ;;  %v750_v23 = vadd.f32 %v749_v4, %v709_v21 }
 0x121   :  { %v712_v5 = vpop.f32.mrf.mxu0 }
 0x122   :  { %v753_v8 = vpop.f32.mrf.mxu1  ;;  %v752_v25 = vadd.f32 %v751_v6, %v711_v22 }
 0x123   :  { %v713_v7 = vpop.f32.mrf.mxu0 }
 0x124   :  { %v754_v9 = vpop.f32.mrf.mxu1 }
 0x126   :  { %v831_v10 = vpop.f32.mrf.mxu1 }
 0x128   :  { %v833_v11 = vpop.f32.mrf.mxu1 }
 0x12a   :  { %v835_v12 = vpop.f32.mrf.mxu1 }
 0x12c   :  { %v836_v13 = vpop.f32.mrf.mxu1 }
 0x15d   :  { %v790_v24 = vpop.f32.mrf.mxu0 }
 0x15e   :  { %v791_v26 = vadd.f32 %v790_v24, %v750_v23 }
 0x15f   :  { %v792_v27 = vpop.f32.mrf.mxu0 }
 0x160   :  { %v832_v28 = vadd.f32 %v831_v10, %v791_v26  ;;  %v793_v29 = vadd.f32 %v792_v27, %v752_v25 }
 0x161   :  { %v794_v30 = vpop.f32.mrf.mxu0 }
 0x162   :  { %v834_v31 = vadd.f32 %v833_v11, %v793_v29  ;;  %v838_v32 = vmax.f32 %v832_v28, 0.0 }
 0x163   :  { %v795_v33 = vpop.f32.mrf.mxu0 }
 0x164   :  { %v839_v34 = vmax.f32 %v834_v31, 0.0  ;;  %v840_v37 = vpack.c.bf16 %v838_v32, %v838_v32 }
 0x166   :  { %v841_v35 = vpack.c.bf16 %v839_v34, %v839_v34 }
 0x168   :  { %1009 = vmatprep.mubr.bf16.mxu1 %v841_v35 }
 0x169   :  { %1010 = vmatmul.mubr.bf16.vlgmr.msra.gmra.mxu1 %v840_v37 }
 0x16a   :  { %1318 = vmatpush3.bf16.msra.mxu1 %v1508_v36  ;;  %1333 = vmatprep.mubr.msk.bf16.mxu1 %vm1592_vm1, %v1591_v1 }
 0x16b   :  { %1319 = vmatprep.subr.bf16.mxu1 %v1591_v1 }
 0x16e   :  { %1320 = vmatpush3.bf16.msra.mxu1 %v1509_v38 }
 0x16f   :  { %1321 = vmatprep.subr.bf16.mxu1 %v1591_v1 }
 0x172   :  { %1322 = vmatpush3.bf16.msra.mxu1 %v1510_v39 }
 0x173   :  { %1323 = vmatprep.subr.bf16.mxu1 %v1591_v1 }
 0x176   :  { %1324 = vmatpush3.bf16.msra.mxu1 %v1511_v40 }
 0x177   :  { %1325 = vmatprep.subr.bf16.mxu1 %v1591_v1 }
 0x17a   :  { %1326 = vmatpush3.bf16.msra.mxu1 %v1512_v41 }
 0x17b   :  { %1327 = vmatprep.subr.bf16.mxu1 %v1591_v1 }
 0x17e   :  { %1328 = vmatpush3.bf16.msra.mxu1 %v1513_v42 }
 0x17f   :  { %1329 = vmatprep.subr.bf16.mxu1 %v1591_v1 }
 0x182   :  { %1330 = vmatpush3.bf16.msra.mxu1 %v1514_v43 }
 0x183   :  { %1331 = vmatprep.subr.bf16.mxu1 %v1591_v1 }
 0x186   :  { %1332 = vmatpush3.bf16.msra.mxu1 %v1515_v44 }
 0x229   :  { %v1302_v45 = vpop.f32.mrf.mxu1 }
 0x22b   :  { %v1303_v47 = vpop.f32.mrf.mxu1 }
 0x22c   :  { %v1304_v48 = vadd.f32 %v1303_v47, %v1302_v45 }
 0x22d   :  { %v1305_v49 = vpop.f32.mrf.mxu1 }
 0x22e   :  { %v1012_v50 = vadd.f32 %v1304_v48, %v1260_v46 }
 0x22f   :  { %v1306_v51 = vpop.f32.mrf.mxu1 }
 0x230   :  { %v1017_v52 = vmax.f32 %v1012_v50, 0.0 }
 0x232   :  { %v1018_v53 = vpack.c.bf16 %v1017_v52, %v1017_v52 }
 0x234   :  { %1334 = vmatmul.mubr.bf16.vlgmr.msra.gmra.mxu1 %v1018_v53 }
 0x2f4   :  { %v1124_v56 = vpop.f32.mrf.mxu1 }
 0x2f5   :  { %v1125_v57 = vadd.f32 %v1277_v55, %v1124_v56 }
 0x2f6   :  { %v1335_v58 = vpop.f32.mrf.mxu1 }
 0x2f7   :  { %v1133_v59 = vsel %vm1132_vm2, %v1125_v57, -1e+30 }
 0x2f8   :  { %1134 = vmax.xlane.f32.xlu0 %v1133_v59  ;;  %v1127_v60 = vpop.f32.mrf.mxu1 }
 0x2fa   :  { %v1336_v61 = vpop.f32.mrf.mxu1 }
 0x381   :  { %v1135_v62 = vpop.xlane.xlu0 %1134 }
 0x382   :  { %v1136_v63 = vsub.f32 %v1133_v59, %v1135_v62 }
 0x384   :  { %v1137_v0 = vmul.f32 1.442695, %v1136_v63 }
 0x386   :  { %1516 = vpow2.f32 %v1137_v0 }
 0x393   :  { %v1517_v1 = vpop.eup %1516 }
 0x394   :  { %1139 = vadd.xlane.f32.xlu0 %v1517_v1 }
 0x41d   :  { %v1140_v2 = vpop.xlane.xlu0 %1139 }
 0x41e   :  { %1518 = vlog2.f32 %v1140_v2 }
 0x42b   :  { %v1519_v3 = vpop.eup %1518 }
 0x42c   :  { %v1142_v4 = vmul.f32 0.6931472, %v1519_v3 }
 0x42e   :  { %v1143_v5 = vsub.f32 %v1136_v63, %v1142_v4 }
 0x430   :  { %1144 = vst [vmem:[#allocation7] sm:$0xff] %v1143_v5 }
 0x431   :  { %1571 = shalt.err (!%p1568_p0)
}
 0x432   :  { %1154 = dma.vmem_to_hbm [thread:$0]  %s1152_s24, 128, %s1984_s7, [#allocation4]  }
 0x433   :  { %1584 = dma.done.wait [#allocation4], 128  }
 0x434   :  { %1585 = vsyncadd [#allocation4], 4294967168 }
 0x435   :  { %1158 = vsyncpa [#allocation3], 1 }
 0x436   :  { %1159 = vsyncpa [#allocation6], 1 }
 0x437   :  { %1160 = vsyncpa [#allocation4], 1 }

</bundles_post_ra>
